<compile_context>
chip_gen: v7x
topology: tpu7x:2x2x1
jax: 0.10.0
libtpu: 0.0.40
codegen_flags: <defaults>
</compile_context>

<pallas_src>
import functools

import jax
import jax.numpy as jnp
from jax.experimental import pallas as pl
from jax.experimental.pallas import tpu as pltpu


def _ceil_div(a, b):
    return -(-a // b)


def _fused_nll_kernel(imeta_ref, fmeta_ref, mu_ref, sigma2_ref, v0_ref, *rest,
                      eps, use_weight, block_rows):
    """One (block_rows, 128) tile per grid step; node blocks first, then edge.

    imeta (SMEM, int32):  [num_node_blocks, n_node, n_edge]
    fmeta (SMEM, f32):    [1/n_node, 1/n_edge, lamb]
    acc   (SMEM scratch): [node_sum, edge_sum]
    out   (SMEM, f32):    [node_loss, edge_loss, total]
    """
    if use_weight:
        out_ref, acc_ref = rest
        v1_ref = None
    else:
        v1_ref, out_ref, acc_ref = rest

    i = pl.program_id(0)

    @pl.when(i == 0)
    def _init():
        acc_ref[0] = 0.0
        acc_ref[1] = 0.0

    nblk_node = imeta_ref[0]
    seg_is_edge = i >= nblk_node                       # node blocks come first
    count = jnp.where(seg_is_edge, imeta_ref[2], imeta_ref[1])
    blk_in_seg = i - jnp.where(seg_is_edge, nblk_node, 0)

    # In-kernel valid mask: element (r, c) of this tile is sample
    # blk_in_seg*block_rows*128 + r*128 + c of its segment.
    row_ids = jax.lax.broadcasted_iota(jnp.int32, (block_rows, 128), 0)
    col_ids = jax.lax.broadcasted_iota(jnp.int32, (block_rows, 128), 1)
    idx = blk_in_seg * (block_rows * 128) + row_ids * 128 + col_ids
    valid = idx < count

    sigma2 = sigma2_ref[...]
    denom = eps + sigma2
    diff = v0_ref[...] - mu_ref[...]
    per_elem = 0.5 * jnp.log(denom) + (diff * diff) / denom
    # Matches the PyTorch module exactly: value[:, 1] multiplies the term when
    # use_weight is False (the module's default branch).
    if not use_weight:
        per_elem = per_elem * v1_ref[...]
    per_elem = jnp.where(valid, per_elem, 0.0)         # select, not multiply
    s = jnp.sum(per_elem)

    acc_ref[0] += jnp.where(seg_is_edge, 0.0, s)
    acc_ref[1] += jnp.where(seg_is_edge, s, 0.0)

    @pl.when(i == pl.num_programs(0) - 1)
    def _finalize():
        node_loss = acc_ref[0] * fmeta_ref[0]
        edge_loss = acc_ref[1] * fmeta_ref[1]
        lamb = fmeta_ref[2]
        out_ref[0] = node_loss
        out_ref[1] = edge_loss
        out_ref[2] = node_loss * lamb + edge_loss * (1.0 - lamb)


def _pad_to_slab(x, rows, pad_val):
    n = x.shape[0]
    total = rows * 128
    x = jnp.pad(x.astype(jnp.float32), (0, total - n), constant_values=pad_val)
    return x.reshape(rows, 128)


def _choose_block_rows(n_node, n_edge):
    # (block_rows, 128) f32 tiles; cap at 512 rows (256 KiB/stream) so 4
    # double-buffered streams stay well inside a 32 MiB scoped-VMEM budget
    # (portable to v7x's 64 MiB physical VMEM).
    rows_needed = max(_ceil_div(max(n_node, n_edge, 1), 128), 1)
    return min(512, 8 * _ceil_div(rows_needed, 8))


def nll_loss_pallas(ins, target, eps=1.0, lamb=0.5, use_weight=False,
                    block_rows=None):
    """Mirrors NLLLoss.forward.

    ins    = (n_mu, n_sigma2, e_mu, e_sigma2)
    target = (batch_node_key, batch_node_value, batch_edge_key, batch_edge_value)
    """
    n_mu, n_sigma2, e_mu, e_sigma2 = ins
    node_key, node_value, edge_key, edge_value = target

    # torch.Tensor.take indexes the flattened tensor — replicate with ravel+take.
    pre_node_mu = jnp.take(n_mu.ravel(), node_key)
    pre_node_sigma2 = jnp.take(n_sigma2.ravel(), node_key)
    pre_edge_mu = jnp.take(e_mu.ravel(), edge_key)
    pre_edge_sigma2 = jnp.take(e_sigma2.ravel(), edge_key)

    n_node = int(node_key.shape[0])
    n_edge = int(edge_key.shape[0])

    if block_rows is None:
        block_rows = _choose_block_rows(n_node, n_edge)
    assert block_rows % 8 == 0 and block_rows >= 8

    nblk_node = _ceil_div(max(_ceil_div(n_node, 128), 1), block_rows)
    nblk_edge = _ceil_div(max(_ceil_div(n_edge, 128), 1), block_rows)
    rows_node = nblk_node * block_rows
    rows_edge = nblk_edge * block_rows

    def slab(node_x, edge_x, pad_val):
        return jnp.concatenate(
            [_pad_to_slab(node_x, rows_node, pad_val),
             _pad_to_slab(edge_x, rows_edge, pad_val)], axis=0)

    mu_s = slab(pre_node_mu, pre_edge_mu, 0.0)
    sg_s = slab(pre_node_sigma2, pre_edge_sigma2, 1.0)  # keep log finite pre-mask
    v0_s = slab(node_value[:, 0], edge_value[:, 0], 0.0)
    operands = [mu_s, sg_s, v0_s]
    if not use_weight:
        operands.append(slab(node_value[:, 1], edge_value[:, 1], 0.0))

    imeta = jnp.array([nblk_node, n_node, n_edge], dtype=jnp.int32)
    fmeta = jnp.array([1.0 / n_node, 1.0 / n_edge, float(lamb)],
                      dtype=jnp.float32)

    smem_spec = pl.BlockSpec(memory_space=pltpu.MemorySpace.SMEM)
    tile_spec = pl.BlockSpec((block_rows, 128), lambda i: (i, 0))

    kernel = functools.partial(_fused_nll_kernel, eps=float(eps),
                               use_weight=bool(use_weight),
                               block_rows=block_rows)

    out = pl.pallas_call(
        kernel,
        out_shape=jax.ShapeDtypeStruct((3,), jnp.float32),
        grid=(nblk_node + nblk_edge,),
        in_specs=[smem_spec, smem_spec] + [tile_spec] * len(operands),
        out_specs=smem_spec,
        scratch_shapes=[pltpu.SMEM((2,), jnp.float32)],
        compiler_params=pltpu.CompilerParams(
            dimension_semantics=("arbitrary",),
            vmem_limit_bytes=32 << 20),
    )(imeta, fmeta, *operands)

    return out[0], out[1], out[2]


def _nll_loss_ref(ins, target, eps=1.0, lamb=0.5, use_weight=False):
    """Pure-JAX reference for correctness checking."""
    n_mu, n_sigma2, e_mu, e_sigma2 = ins
    node_key, node_value, edge_key, edge_value = target
    pnm = jnp.take(n_mu.ravel(), node_key)
    pns = jnp.take(n_sigma2.ravel(), node_key)
    pem = jnp.take(e_mu.ravel(), edge_key)
    pes = jnp.take(e_sigma2.ravel(), edge_key)
    if use_weight:
        nl = jnp.mean(0.5 * jnp.log(eps + pns) + (node_value[:, 0] - pnm) ** 2 / (eps + pns))
        el = jnp.mean(0.5 * jnp.log(eps + pes) + (edge_value[:, 0] - pem) ** 2 / (eps + pes))
    else:
        nl = jnp.mean((0.5 * jnp.log(eps + pns) + (node_value[:, 0] - pnm) ** 2 / (eps + pns)) * node_value[:, 1])
        el = jnp.mean((0.5 * jnp.log(eps + pes) + (edge_value[:, 0] - pem) ** 2 / (eps + pes)) * edge_value[:, 1])
    return nl, el, nl * lamb + el * (1.0 - lamb)


def _check(ins, target, eps, lamb, use_weight, block_rows=None):
    nl, el, tot = nll_loss_pallas(ins, target, eps=eps, lamb=lamb,
                                  use_weight=use_weight, block_rows=block_rows)
    jax.block_until_ready(tot)
    rnl, rel, rtot = _nll_loss_ref(ins, target, eps=eps, lamb=lamb,
                                   use_weight=use_weight)
    assert jnp.allclose(nl, rnl, rtol=1e-5, atol=1e-5), (nl, rnl)
    assert jnp.allclose(el, rel, rtol=1e-5, atol=1e-5), (el, rel)
    assert jnp.allclose(tot, rtot, rtol=1e-5, atol=1e-5), (tot, rtot)


if __name__ == "__main__":
    key = jax.random.PRNGKey(0)
    ks = jax.random.split(key, 8)

    num_nodes, num_edges = 32, 64   # size of the flattened prediction tensors
    N, M = 24, 40                   # number of supervised node / edge samples

    n_mu = jax.random.normal(ks[0], (num_nodes,), dtype=jnp.float32)
    n_sigma2 = jax.nn.softplus(jax.random.normal(ks[1], (num_nodes,), dtype=jnp.float32))
    e_mu = jax.random.normal(ks[2], (num_edges,), dtype=jnp.float32)
    e_sigma2 = jax.nn.softplus(jax.random.normal(ks[3], (num_edges,), dtype=jnp.float32))

    node_key = jax.random.randint(ks[4], (N,), 0, num_nodes, dtype=jnp.int32)
    node_value = jax.random.normal(ks[5], (N, 2), dtype=jnp.float32)
    edge_key = jax.random.randint(ks[6], (M,), 0, num_edges, dtype=jnp.int32)
    edge_value = jax.random.normal(ks[7], (M, 2), dtype=jnp.float32)

    ins = (n_mu, n_sigma2, e_mu, e_sigma2)
    target = (node_key, node_value, edge_key, edge_value)

    # Default (use_weight=False) path.
    _check(ins, target, eps=1.0, lamb=0.5, use_weight=False)
    # Weighted path (value[:, 1] stream is dropped entirely).
    _check(ins, target, eps=1.0, lamb=0.5, use_weight=True)

    # Medium case exercising the multi-block grid / accumulator path
    # (block_rows=8 -> node: 2 blocks, edge: 3 blocks).
    N2, M2 = 1500, 2100
    k2 = jax.random.split(jax.random.PRNGKey(0), 4)
    node_key2 = jax.random.randint(k2[0], (N2,), 0, num_nodes, dtype=jnp.int32)
    node_value2 = jax.random.normal(k2[1], (N2, 2), dtype=jnp.float32)
    edge_key2 = jax.random.randint(k2[2], (M2,), 0, num_edges, dtype=jnp.int32)
    edge_value2 = jax.random.normal(k2[3], (M2, 2), dtype=jnp.float32)
    target2 = (node_key2, node_value2, edge_key2, edge_value2)
    _check(ins, target2, eps=1.0, lamb=0.3, use_weight=False, block_rows=8)

    print("KERNEL_OK")
</pallas_src>

<mosaic_0001>
module attributes {stable_mosaic.version = 11 : i64} {
  func.func @_fused_nll_kernel(%arg0: i32, %arg1: memref<3xi32, #tpu.memory_space<smem>>, %arg2: memref<3xf32, #tpu.memory_space<smem>>, %arg3: memref<8x128xf32, #tpu.memory_space<vmem>>, %arg4: memref<8x128xf32, #tpu.memory_space<vmem>>, %arg5: memref<8x128xf32, #tpu.memory_space<vmem>>, %arg6: memref<8x128xf32, #tpu.memory_space<vmem>>, %arg7: memref<3xf32, #tpu.memory_space<smem>>, %arg8: memref<2xf32, #tpu.memory_space<smem>>) attributes {dimension_semantics = [#tpu.dimension_semantics<arbitrary>], iteration_bounds = array<i64: 2>, scalar_prefetch = 0 : i64, scratch_operands = 1 : i64, tpu.core_type = #tpu.core_type<tc>, window_params = [{transform_indices = @transform_0, window_bounds = array<i64: 3>}, {transform_indices = @transform_1, window_bounds = array<i64: 3>}, {transform_indices = @transform_2, window_bounds = array<i64: 8, 128>}, {transform_indices = @transform_3, window_bounds = array<i64: 8, 128>}, {transform_indices = @transform_4, window_bounds = array<i64: 8, 128>}, {transform_indices = @transform_5, window_bounds = array<i64: 8, 128>}, {transform_indices = @transform_6, window_bounds = array<i64: 3>}]} {
    %c0_i32 = arith.constant 0 : i32
    %0 = arith.cmpi eq, %arg0, %c0_i32 : i32
    %1 = arith.extui %0 : i1 to i32
    %c0_i32_0 = arith.constant 0 : i32
    %2 = arith.cmpi ne, %1, %c0_i32_0 : i32
    scf.if %2 {
      %cst_20 = arith.constant 0.000000e+00 : f32
      %c0_21 = arith.constant 0 : index
      %51 = memref.load %arg8[%c0_21] : memref<2xf32, #tpu.memory_space<smem>>
      memref.store %cst_20, %arg8[%c0_21] : memref<2xf32, #tpu.memory_space<smem>>
      %cst_22 = arith.constant 0.000000e+00 : f32
      %c1_23 = arith.constant 1 : index
      %52 = memref.load %arg8[%c1_23] : memref<2xf32, #tpu.memory_space<smem>>
      memref.store %cst_22, %arg8[%c1_23] : memref<2xf32, #tpu.memory_space<smem>>
    } else {
    }
    %c0 = arith.constant 0 : index
    %3 = memref.load %arg1[%c0] : memref<3xi32, #tpu.memory_space<smem>>
    %4 = arith.cmpi sge, %arg0, %3 : i32
    %c2 = arith.constant 2 : index
    %5 = memref.load %arg1[%c2] : memref<3xi32, #tpu.memory_space<smem>>
    %c1 = arith.constant 1 : index
    %6 = memref.load %arg1[%c1] : memref<3xi32, #tpu.memory_space<smem>>
    %7 = arith.select %4, %5, %6 : i32
    %c0_i32_1 = arith.constant 0 : i32
    %8 = arith.select %4, %3, %c0_i32_1 : i32
    %9 = arith.subi %arg0, %8 : i32
    %10 = tpu.iota {dimensions = array<i32: 0>} : vector<8x128xi32>
    %11 = tpu.iota {dimensions = array<i32: 1>} : vector<8x128xi32>
    %c1024_i32 = arith.constant 1024 : i32
    %12 = arith.muli %9, %c1024_i32 : i32
    %c128_i32 = arith.constant 128 : i32
    %13 = vector.broadcast %c128_i32 : i32 to vector<8x128xi32>
    %14 = arith.muli %10, %13 : vector<8x128xi32>
    %15 = vector.broadcast %12 : i32 to vector<8x128xi32>
    %16 = arith.addi %15, %14 : vector<8x128xi32>
    %17 = arith.addi %16, %11 : vector<8x128xi32>
    %18 = vector.broadcast %7 : i32 to vector<8x128xi32>
    %19 = arith.cmpi slt, %17, %18 : vector<8x128xi32>
    %c0_2 = arith.constant 0 : index
    %c0_3 = arith.constant 0 : index
    %20 = vector.load %arg4[%c0_2, %c0_3] : memref<8x128xf32, #tpu.memory_space<vmem>>, vector<8x128xf32>
    %cst = arith.constant 1.000000e+00 : f32
    %21 = vector.broadcast %cst : f32 to vector<8x128xf32>
    %22 = arith.addf %21, %20 : vector<8x128xf32>
    %c0_4 = arith.constant 0 : index
    %c0_5 = arith.constant 0 : index
    %23 = vector.load %arg5[%c0_4, %c0_5] : memref<8x128xf32, #tpu.memory_space<vmem>>, vector<8x128xf32>
    %c0_6 = arith.constant 0 : index
    %c0_7 = arith.constant 0 : index
    %24 = vector.load %arg3[%c0_6, %c0_7] : memref<8x128xf32, #tpu.memory_space<vmem>>, vector<8x128xf32>
    %25 = arith.subf %23, %24 : vector<8x128xf32>
    %26 = math.log %22 : vector<8x128xf32>
    %cst_8 = arith.constant 5.000000e-01 : f32
    %27 = vector.broadcast %cst_8 : f32 to vector<8x128xf32>
    %28 = arith.mulf %27, %26 : vector<8x128xf32>
    %29 = arith.mulf %25, %25 : vector<8x128xf32>
    %30 = arith.divf %29, %22 : vector<8x128xf32>
    %31 = arith.addf %28, %30 : vector<8x128xf32>
    %c0_9 = arith.constant 0 : index
    %c0_10 = arith.constant 0 : index
    %32 = vector.load %arg6[%c0_9, %c0_10] : memref<8x128xf32, #tpu.memory_space<vmem>>, vector<8x128xf32>
    %33 = arith.mulf %31, %32 : vector<8x128xf32>
    %cst_11 = arith.constant 0.000000e+00 : f32
    %34 = vector.broadcast %cst_11 : f32 to vector<8x128xf32>
    %35 = arith.select %19, %33, %34 : vector<8x128xi1>, vector<8x128xf32>
    %36 = vector.shape_cast %35 : vector<8x128xf32> to vector<1x8x128xf32>
    %cst_12 = arith.constant dense<0.000000e+00> : vector<1xf32>
    %37 = vector.multi_reduction <add>, %36, %cst_12 [1, 2] : vector<1x8x128xf32> to vector<1xf32>
    %38 = vector.shape_cast %37 : vector<1xf32> to vector<1x1x1xf32>
    %39 = vector.extract %38[0, 0, 0] : f32 from vector<1x1x1xf32>
    %c0_13 = arith.constant 0 : index
    %40 = memref.load %arg8[%c0_13] : memref<2xf32, #tpu.memory_space<smem>>
    %cst_14 = arith.constant 0.000000e+00 : f32
    %41 = arith.select %4, %cst_14, %39 : f32
    %42 = arith.addf %40, %41 : f32
    %c0_15 = arith.constant 0 : index
    %43 = memref.load %arg8[%c0_15] : memref<2xf32, #tpu.memory_space<smem>>
    memref.store %42, %arg8[%c0_15] : memref<2xf32, #tpu.memory_space<smem>>
    %c1_16 = arith.constant 1 : index
    %44 = memref.load %arg8[%c1_16] : memref<2xf32, #tpu.memory_space<smem>>
    %cst_17 = arith.constant 0.000000e+00 : f32
    %45 = arith.select %4, %39, %cst_17 : f32
    %46 = arith.addf %44, %45 : f32
    %c1_18 = arith.constant 1 : index
    %47 = memref.load %arg8[%c1_18] : memref<2xf32, #tpu.memory_space<smem>>
    memref.store %46, %arg8[%c1_18] : memref<2xf32, #tpu.memory_space<smem>>
    %c1_i32 = arith.constant 1 : i32
    %48 = arith.cmpi eq, %arg0, %c1_i32 : i32
    %49 = arith.extui %48 : i1 to i32
    %c0_i32_19 = arith.constant 0 : i32
    %50 = arith.cmpi ne, %49, %c0_i32_19 : i32
    scf.if %50 {
      %c0_20 = arith.constant 0 : index
      %51 = memref.load %arg8[%c0_20] : memref<2xf32, #tpu.memory_space<smem>>
      %c0_21 = arith.constant 0 : index
      %52 = memref.load %arg2[%c0_21] : memref<3xf32, #tpu.memory_space<smem>>
      %53 = arith.mulf %51, %52 : f32
      %c1_22 = arith.constant 1 : index
      %54 = memref.load %arg8[%c1_22] : memref<2xf32, #tpu.memory_space<smem>>
      %c1_23 = arith.constant 1 : index
      %55 = memref.load %arg2[%c1_23] : memref<3xf32, #tpu.memory_space<smem>>
      %56 = arith.mulf %54, %55 : f32
      %c2_24 = arith.constant 2 : index
      %57 = memref.load %arg2[%c2_24] : memref<3xf32, #tpu.memory_space<smem>>
      %c0_25 = arith.constant 0 : index
      %58 = memref.load %arg7[%c0_25] : memref<3xf32, #tpu.memory_space<smem>>
      memref.store %53, %arg7[%c0_25] : memref<3xf32, #tpu.memory_space<smem>>
      %c1_26 = arith.constant 1 : index
      %59 = memref.load %arg7[%c1_26] : memref<3xf32, #tpu.memory_space<smem>>
      memref.store %56, %arg7[%c1_26] : memref<3xf32, #tpu.memory_space<smem>>
      %60 = arith.mulf %53, %57 : f32
      %cst_27 = arith.constant 1.000000e+00 : f32
      %61 = arith.subf %cst_27, %57 : f32
      %62 = arith.mulf %56, %61 : f32
      %63 = arith.addf %60, %62 : f32
      %c2_28 = arith.constant 2 : index
      %64 = memref.load %arg7[%c2_28] : memref<3xf32, #tpu.memory_space<smem>>
      memref.store %63, %arg7[%c2_28] : memref<3xf32, #tpu.memory_space<smem>>
    } else {
    }
    return
  }
  func.func @transform_0(%arg0: i32) -> i32 {
    %c0_i32 = arith.constant 0 : i32
    %c0_i32_0 = arith.constant 0 : i32
    return %c0_i32 : i32
  }
  func.func @transform_1(%arg0: i32) -> i32 {
    %c0_i32 = arith.constant 0 : i32
    %c0_i32_0 = arith.constant 0 : i32
    return %c0_i32 : i32
  }
  func.func @transform_2(%arg0: i32) -> (i32, i32) {
    %c0_i32 = arith.constant 0 : i32
    %c0_i32_0 = arith.constant 0 : i32
    return %arg0, %c0_i32 : i32, i32
  }
  func.func @transform_3(%arg0: i32) -> (i32, i32) {
    %c0_i32 = arith.constant 0 : i32
    %c0_i32_0 = arith.constant 0 : i32
    return %arg0, %c0_i32 : i32, i32
  }
  func.func @transform_4(%arg0: i32) -> (i32, i32) {
    %c0_i32 = arith.constant 0 : i32
    %c0_i32_0 = arith.constant 0 : i32
    return %arg0, %c0_i32 : i32, i32
  }
  func.func @transform_5(%arg0: i32) -> (i32, i32) {
    %c0_i32 = arith.constant 0 : i32
    %c0_i32_0 = arith.constant 0 : i32
    return %arg0, %c0_i32 : i32, i32
  }
  func.func @transform_6(%arg0: i32) -> i32 {
    %c0_i32 = arith.constant 0 : i32
    %c0_i32_0 = arith.constant 0 : i32
    return %c0_i32 : i32
  }
}

</mosaic_0001>

<bundles_post_ra>
// kernel: tpu_custom_call.1
= control target key start
LH: loop header
LB: loop body
LE: loop exit
PB: predicated region body
PF: predicated region fallthrough
CT: control target
= control target key end

     0   :  { %s1208_s0 = inlined_call_operand.hbm [shape: s32[3], index: 0, kind: input, shape index: {}]   ;;  %s1209_s1 = inlined_call_operand.vmem [shape: f32[3], index: 1, kind: input, shape index: {}]   ;;  %s1210_s2 = inlined_call_operand.hbm [shape: f32[16,128], index: 2, kind: input, shape index: {}]   ;;  %s1211_s3 = inlined_call_operand.hbm [shape: f32[16,128], index: 3, kind: input, shape index: {}]   ;;  %s1212_s4 = inlined_call_operand.hbm [shape: f32[16,128], index: 4, kind: input, shape index: {}]   ;;  %s1213_s5 = inlined_call_operand.vmem [shape: f32[16,128], index: 5, kind: input, shape index: {}]   ;;  %s1214_s6 = inlined_call_operand.hbm [shape: f32[3], index: 6, kind: output, shape index: {}]  }
   0x1   :  { %1220 = sst [smem:[#allocation19_spill]] %s1209_s1 }
   0x2   :  { %1221 = sst [smem:[#allocation20_spill]] %s1211_s3 }
   0x3   :  { %11 = vsyncpa [#allocation5], 0 }
   0x4   :  { %12 = vsyncpa [#allocation7], 0 }
   0x5   :  { %13 = vsyncpa [#allocation4], 0 }
   0x6   :  { %15 = vsyncpa [#allocation4 + $0x1], 0 }
   0x7   :  { %16 = vsyncpa [#allocation11], 0 }
   0x8   :  { %18 = vsyncpa [#allocation11 + $0x1], 0 }
   0x9   :  { %19 = vsyncpa [#allocation6], 0  ;;  %s932_s21 = smov 0   ;;  %s934_s22 = smov 0  }
   0xa   :  { %s936_s23 = smov 0   ;;  %s938_s24 = smov 0  }
   0xb LB: > { %s953_s25 = sadd.s32 1, %s888_s24   ;;  %s74_s26 = sadd.s32 1, %s884_s23  ;;  %s888_s24 = sphi %s938_s24, %s1242_s24   ;;  %s884_s23 = sphi %s936_s23, %s1241_s23   ;;  %s880_s22 = sphi %s934_s22, %s1240_s22   ;;  %s876_s21 = sphi %s932_s21, %s1239_s21  }
   0xc   : > { %s71_s27 = ssub.s32 %s888_s24, %s953_s25  ;;  %p81_p0 = scmp.ne.s32.totalorder %s884_s23, %s880_s22 }
   0xd   : > { %p72_p1 = scmp.eq.s32.totalorder %s71_s27, 0  ;;  %p82_p2 = scmp.eq.s32.totalorder %s888_s24, 0 }
   0xe   : > { %p661_p3 = scmp.lt.s32.totalorder %s888_s24, 2  ;;  %s1215_s29 = sand.u32 1, %s884_s23  }
   0xf   : > { %s963_s28 = scalar_select %p72_p1, %s884_s23, %s74_s26  }
  0x10   : > { %p83_p4 = por %p82_p2, %p81_p0  ;;  %s968_s30 = sshll.u32 %s1215_s29, 3 }
  0x11   : > { %s971_s7 = sshll.u32 %s888_s24, 7  ;;  %s248_s9 = sand.u32 1, %s888_s24  }
  0x12   : > { %p973_p5 = pnand %p661_p3, %p83_p4  ;;  %s1223_s3 = sld [smem:[#allocation20_spill]] }
  0x13   : > { %s252_s13 = scalar_lea.vmem [#allocation10], %s968_s30  ;;  %s987_s15 = scalar_lea.sflag [#allocation11], %s248_s9 }
  0x14   : > { %s1222_s8 = scalar_select %p973_p5, 1, 0 }
  0x15   : > { %s259_s14 = sshll.u32 %s252_s13, 4  ;;  %p993_p7 = pneg %p973_p5  ;;  %s985_s14 = int_to_ptr.vmem [resolvable:$true] %s259_s14 }
  0x18   : > { %s982_s12 = scalar_lea.hbm %s1223_s3, %s971_s7  ;;  %s713_s20 = scalar_lea.hbm %s1223_s3, 256 }
  0x19   : > { %s708_s16 = scalar_lea.hbm %s982_s12, 128  ;;  %p714_p10 = scmp.lt.u32.totalorder %s982_s12, %s1223_s3 }
  0x1a   : > { %p709_p6 = scmp.ne.s32.totalorder %s982_s12, %s708_s16  ;;  %p715_p11 = scmp.lt.u32.totalorder %s713_s20, %s708_s16 }
  0x1b   : > { %p717_p13 = scmp.lt.u32.totalorder %s708_s16, %s982_s12 }
  0x1c   : > { %p711_p8 = pnand %p993_p7, %p709_p6  ;;  %p716_p12 = por %p715_p11, %p714_p10 }
  0x1e   : > { %p712_p9 = pneg %p711_p8  ;;  %p718_p0 = por %p717_p13, %p716_p12 }
  0x20   : > { %p719_p1 = pnand %p718_p0, %p712_p9 }
  0x22   : > { %722 = shalt.err (!%p719_p1)
}
  0x23   : > { %s723_s9 = scalar_lea.vmem %s985_s14, 128  ;;  %s890_s10 = smov [#allocation10]  }
  0x24   : > { %p724_p2 = scmp.ne.s32.totalorder %s985_s14, %s723_s9  ;;  %s728_s11 = sshll.u32 %s890_s10, 4  ;;  %s729_s11 = int_to_ptr.vmem [resolvable:$false] %s728_s11 }
  0x25   : > { %s730_s13 = scalar_lea.vmem %s729_s11, 256  ;;  %p731_p6 = scmp.lt.s32.totalorder %s985_s14, %s729_s11 }
  0x26   : > { %p726_p3 = pnand %p724_p2, %p993_p7  ;;  %p732_p8 = scmp.lt.s32.totalorder %s730_s13, %s723_s9 }
  0x28   : > { %p727_p4 = pneg %p726_p3  ;;  %p733_p10 = por %p732_p8, %p731_p6 }
  0x2a   : > { %p734_p11 = pnand %p733_p10, %p727_p4 }
  0x2c   : > { %737 = shalt.err (!%p734_p11)
}
  0x2d   : > { %655 = dma.hbm_to_vmem [thread:$0]  (!%p973_p5), %s982_s12, 128, %s985_s14, %s987_s15  }
  0x2e   : > { %s1018_s16 = sadd.s32 4294967295, %s888_s24   ;;  %p87_p9 = scmp.ne.s32.totalorder %s880_s22, %s876_s21 }
  0x2f   : > { %p1216_p12 = scmp.eq.s32.totalorder %s1018_s16, 0  ;;  %p585_p13 = scmp.ge.s32.totalorder %s888_s24, 1 }
  0x30   : > { %p197_p0 = scmp.lt.s32.totalorder %s888_s24, 3  ;;  %s1227_s1 = sld [smem:[#allocation19_spill]] }
  0x31   : > { %p1027_p1 = por %p1216_p12, %p87_p9  ;;  %s1044_s24 = scalar_lea.hbm %s1210_s2, %s971_s7 }
  0x32   : > { %p1031_p2 = pnand %p585_p13, %p197_p0  ;;  %s234_s9 = scalar_lea.vmem [#allocation9], %s968_s30 }
  0x33   : > { %s1225_s18 = scalar_select %p1027_p1, 1, 0 }
  0x34   : > { %s1226_s19 = scalar_select %p1031_p2, 1, 0 }
  0x35   : > { %p642_p3 = pneg %p1031_p2  ;;  %s241_s10 = sshll.u32 %s234_s9, 4  ;;  %s1053_s10 = int_to_ptr.vmem [resolvable:$true] %s241_s10 }
  0x36   : > { %s219_s20 = sshll.u32 %s1227_s1, 4  ;;  %s1059_s12 = scalar_lea.hbm %s1212_s4, %s971_s7  ;;  %s220_s20 = int_to_ptr.vmem [resolvable:$true] %s219_s20 }
  0x37   : > { %p1048_p4 = pnand %p642_p3, %p1216_p12  ;;  %s738_s21 = scalar_lea.hbm %s1208_s0, 16 }
  0x38   : > { %p739_p6 = scmp.ne.s32.totalorder %s1208_s0, %s738_s21  ;;  %p745_p9 = scmp.lt.u32.totalorder %s738_s21, %s1208_s0 }
  0x39   : > { %p740_p8 = pneg %p1048_p4 }
  0x3b   : > { %p741_p10 = pnand %p740_p8, %p739_p6 }
  0x3d   : > { %p742_p11 = pneg %p741_p10 }
  0x3f   : > { %p747_p13 = pnand %p745_p9, %p742_p11 }
  0x41   : > { %750 = shalt.err (!%p747_p13)
}
  0x42   : > { %s891_s7 = smov [#allocation3]   ;;  %s751_s13 = scalar_lea.vmem %s220_s20, 16 }
  0x43   : > { %645 = dma.hbm_to_smem (!%p1048_p4), %s1208_s0, 16, %s891_s7, [#allocation5]  }
  0x44   : > { %p752_p0 = scmp.ne.s32.totalorder %s220_s20, %s751_s13  ;;  %p759_p1 = scmp.lt.s32.totalorder %s220_s20, %s220_s20 }
  0x45   : > { %p760_p6 = scmp.lt.s32.totalorder %s751_s13, %s751_s13 }
  0x46   : > { %p754_p3 = pnand %p752_p0, %p740_p8 }
  0x47   : > { %p761_p10 = por %p760_p6, %p759_p1 }
  0x48   : > { %p755_p12 = pneg %p754_p3 }
  0x4a   : > { %p762_p2 = pnand %p761_p10, %p755_p12 }
  0x4c   : > { %765 = shalt.err (!%p762_p2)
}
  0x4d   : > { %s892_s1 = smov [#allocation8]   ;;  %s1229_s3 = sand.u32 1, %s884_s23  }
  0x4e   : > { %648 = dma.vmem_to_smem (!%p1048_p4), %s220_s20, 16, %s892_s1, [#allocation7]  }
  0x4f   : > { %s231_s14 = scalar_lea.sflag [#allocation4], %s1229_s3  ;;  %s766_s21 = scalar_lea.hbm %s1044_s24, 128 }
  0x50   : > { %p767_p8 = scmp.ne.s32.totalorder %s1044_s24, %s766_s21  ;;  %s771_s7 = scalar_lea.hbm %s1210_s2, 256 }
  0x51   : > { %p772_p12 = scmp.lt.u32.totalorder %s1044_s24, %s1210_s2  ;;  %p773_p1 = scmp.lt.u32.totalorder %s771_s7, %s766_s21 }
  0x52   : > { %p769_p11 = pnand %p767_p8, %p993_p7  ;;  %p775_p13 = scmp.lt.u32.totalorder %s766_s21, %s1044_s24 }
  0x53   : > { %p774_p2 = por %p773_p1, %p772_p12 }
  0x54   : > { %p770_p9 = pneg %p769_p11 }
  0x55   : > { %p776_p0 = por %p775_p13, %p774_p2 }
  0x57   : > { %p777_p4 = pnand %p776_p0, %p770_p9 }
  0x59   : > { %780 = shalt.err (!%p777_p4)
}
  0x5a   : > { %s781_s20 = scalar_lea.vmem %s1053_s10, 128  ;;  %s893_s29 = smov [#allocation9]  }
  0x5b   : > { %p782_p3 = scmp.ne.s32.totalorder %s1053_s10, %s781_s20  ;;  %s786_s13 = sshll.u32 %s893_s29, 4  ;;  %s787_s13 = int_to_ptr.vmem [resolvable:$false] %s786_s13 }
  0x5c   : > { %s788_s1 = scalar_lea.vmem %s787_s13, 256  ;;  %p789_p8 = scmp.lt.s32.totalorder %s1053_s10, %s787_s13 }
  0x5d   : > { %p784_p6 = pnand %p782_p3, %p993_p7  ;;  %p790_p11 = scmp.lt.s32.totalorder %s788_s1, %s781_s20 }
  0x5f   : > { %p785_p10 = pneg %p784_p6  ;;  %p791_p12 = por %p790_p11, %p789_p8 }
  0x61   : > { %p792_p1 = pnand %p791_p12, %p785_p10 }
  0x63   : > { %795 = shalt.err (!%p792_p1)
}
  0x64   : > { %652 = dma.hbm_to_vmem [thread:$0]  (!%p973_p5), %s1044_s24, 128, %s1053_s10, %s231_s14  }
  0x65   : > { %s270_s3 = scalar_lea.vmem [#allocation12], %s968_s30  ;;  %s796_s26 = scalar_lea.hbm %s1059_s12, 128 }
  0x66   : > { %s277_s21 = sshll.u32 %s270_s3, 4  ;;  %p797_p9 = scmp.ne.s32.totalorder %s1059_s12, %s796_s26  ;;  %s278_s21 = int_to_ptr.vmem [resolvable:$true] %s277_s21 }
  0x67   : > { %s801_s11 = scalar_lea.hbm %s1212_s4, 256  ;;  %p802_p0 = scmp.lt.u32.totalorder %s1059_s12, %s1212_s4 }
  0x68   : > { %p799_p2 = pnand %p797_p9, %p993_p7  ;;  %p803_p4 = scmp.lt.u32.totalorder %s801_s11, %s796_s26 }
  0x69   : > { %p805_p6 = scmp.lt.u32.totalorder %s796_s26, %s1059_s12 }
  0x6a   : > { %p800_p13 = pneg %p799_p2  ;;  %p804_p3 = por %p803_p4, %p802_p0 }
  0x6c   : > { %p806_p10 = por %p805_p6, %p804_p3 }
  0x6e   : > { %p807_p8 = pnand %p806_p10, %p800_p13 }
  0x70   : > { %810 = shalt.err (!%p807_p8)
}
  0x71   : > { %s811_s30 = scalar_lea.vmem %s278_s21, 128  ;;  %s894_s24 = smov [#allocation12]  }
  0x72   : > { %p812_p11 = scmp.ne.s32.totalorder %s278_s21, %s811_s30  ;;  %s816_s10 = sshll.u32 %s894_s24, 4  ;;  %s817_s10 = int_to_ptr.vmem [resolvable:$false] %s816_s10 }
  0x73   : > { %s818_s14 = scalar_lea.vmem %s817_s10, 256  ;;  %p819_p9 = scmp.lt.s32.totalorder %s278_s21, %s817_s10 }
  0x74   : > { %p814_p12 = pnand %p812_p11, %p993_p7  ;;  %p820_p2 = scmp.lt.s32.totalorder %s818_s14, %s811_s30 }
  0x76   : > { %p815_p1 = pneg %p814_p12  ;;  %p821_p5 = por %p820_p2, %p819_p9 }
  0x78   : > { %p822_p0 = pnand %p821_p5, %p815_p1 }
  0x7a   : > { %825 = shalt.err (!%p822_p0)
}
  0x7b   : > { %p1230_p4 = scmp.ne.s32.totalorder %s1222_s8, 0  ;;  %p1231_p13 = scmp.ne.s32.totalorder %s1226_s19, 0 }
  0x7c   : > { %p1232_p7 = scmp.eq.s32.totalorder (!%p1231_p13), %s1018_s16, 0 }
  0x7d   : > { %658 = dma.hbm_to_vmem [thread:$0]  (!%p1230_p4), %s1059_s12, 128, %s278_s21, %s987_s15  }
  0x7e   : > { %293 = sbr.rel (%p1231_p13) target bundleno = 392 (0x188), region = 44 }
  0x85   : > { %855 = dma.done.wait (%p1232_p7), [#allocation5], 16   ;;  %p1233_p3 = pmov %p1232_p7 }
  0x87   : > { %857 = vsyncadd (%p1233_p3), [#allocation5], 4294967280  ;;  %p1234_p6 = pmov %p1233_p3 }
  0x88   : > { %p1235_p5 = pmov %p1233_p3 }
  0x89   : > { %859 = dma.done.wait (%p1234_p6), [#allocation7], 16  }
  0x8a   : > { %861 = vsyncadd (%p1235_p5), [#allocation7], 4294967280  ;;  %s303_s8 = sand.u32 1, %s880_s22   ;;  %p1236_p10 = scmp.ne.s32.totalorder %s1225_s18, 0 }
  0x8b   : > { %s598_s17 = sshll.u32 %s303_s8, 3  ;;  %s304_s15 = scalar_lea.sflag [#allocation4], %s303_s8 }
  0x8c   : > { %s307_s12 = scalar_lea.vmem [#allocation9], %s598_s17 }
  0x8d   : > { %863 = dma.done.wait (%p1236_p10), %s304_s15, 128  }
  0x8e   : > { %865 = vsyncadd (%p1236_p10), %s304_s15, 4294967168  ;;  %s312_s19 = sand.u32 1, %s1018_s16   ;;  %s316_s13 = scalar_lea.vmem [#allocation10], %s598_s17 }
  0x8f   : > { %s313_s29 = scalar_lea.sflag [#allocation11], %s312_s19 }
  0x90   : > { %867 = dma.done.wait (%p1236_p10), %s313_s29, 256  }
  0x91   : > { %869 = vsyncadd (%p1236_p10), %s313_s29, 4294967040  ;;  %s325_s1 = scalar_lea.vmem [#allocation12], %s598_s17 }
  0x92   : > { %330 = sfence }
  0x93   : > { %s1141_s3 = sld [smem:[#allocation3]]  ;;  %v394_v0 = vld [vmem:[%s316_s13] sm:$0xff]  ;;  %s603_s21 = sld [smem:[#allocation3 + $0x2]]  ;;  %v383_v2 = vlaneseq  ;;  %v396_v3 = vld [vmem:[%s325_s1] sm:$0xff] }
  0x94   : > { %v395_v1 = vadd.f32 1.0, %v394_v0  ;;  %s604_s26 = sld [smem:[#allocation3 + $0x1]]  ;;  %p364_p8 = scmp.lt.s32.totalorder %s1018_s16, 1  ;;  %v397_v4 = vld [vmem:[%s307_s12] sm:$0xff] }
  0x95   : > { %v384_v5 = vshrl.u32 %v383_v2, 7  ;;  %v398_v6 = vsub.f32 %v396_v3, %v397_v4  ;;  %v386_v9 = vand.u32 127, %v383_v2  ;;  %s895_s10 = smov 0.0   ;;  %p1237_p12 = pmov %p1233_p3 }
  0x96   : > { %704 = vlog2.f32 %v395_v1  ;;  %s365_s18 = scalar_select %p364_p8, %s1018_s16, 1 }
  0x97   : > { %706 = vrcp.f32 %v395_v1  ;;  %v388_v7 = vmul.u32 128, %v384_v5  ;;  %v402_v8 = vmul.f32 %v398_v6, %v398_v6  ;;  %632 = sst [smem:[#allocation2]] (%p1237_p12), %s895_s10  ;;  %p1238_p1 = pmov %p1233_p3 }
  0x98   : > { %s601_s7 = sshll.u32 %s365_s18, 3  ;;  %s610_s14 = sld [smem:[#allocation8 + $0x2]] }
  0x99   : > { %p377_p11 = scmp.ge.s32.totalorder %s1018_s16, %s1141_s3  ;;  %s367_s24 = scalar_lea.vmem %s1213_s5, %s601_s7 }
  0x9a   : > { %v406_v19 = vld [vmem:[%s367_s24] sm:$0xff]  ;;  %633 = sst [smem:[#allocation2 + $0x1]] (%p1238_p1), %s895_s10  ;;  %s418_s8 = sld [smem:[#allocation2]] }
  0x9b   : > { %s381_s9 = scalar_select %p377_p11, %s1141_s3, 0 }
  0x9c   : > { %s1244_s21 = smov (!%p377_p11, %s603_s21), %s604_s26  ;;  %s606_s17 = sld [smem:[#allocation2 + $0x1]] }
  0x9d   : > { %s382_s11 = ssub.s32 %s1018_s16, %s381_s9  ;;  %v392_v17 = vstv %s1244_s21  ;;  %s433_s15 = sld [smem:[#allocation8]] }
  0x9e   : > { %s605_s27 = sshll.u32 %s382_s11, 10  ;;  %s609_s12 = sld [smem:[#allocation8 + $0x1]] }
  0x9f   : > { %v389_v11 = vstv %s605_s27  ;;  %s444_s29 = ssub.f32 1.0, %s610_s14  ;;  %p665_p9 = scmp.eq.s32.totalorder %s1018_s16, 1 }
  0xa0   : > { %v705_v10 = vpop.eup %704  ;;  %v390_v13 = vadd.s32 %v389_v11, %v388_v7  ;;  %s826_s20 = scalar_lea.hbm %s1214_s6, 16 }
  0xa1   : > { %v707_v12 = vpop.eup %706  ;;  %v400_v14 = vmul.f32 0.6931472, %v705_v10  ;;  %p827_p2 = scmp.ne.s32.totalorder %s1214_s6, %s826_s20  ;;  %p832_p13 = scmp.lt.u32.totalorder %s826_s20, %s1214_s6 }
  0xa2   : > { %v404_v15 = vmul.f32 %v707_v12, %v402_v8  ;;  %v391_v16 = vadd.s32 %v390_v13, %v386_v9 }
  0xa3   : > { %v401_v18 = vmul.f32 0.5, %v400_v14  ;;  %p828_p0 = pnand %p827_p2, %p665_p9 }
  0xa4   : > { %vm393_vm0 = vcmp.lt.s32.totalorder %v391_v16, %v392_v17 }
  0xa5   : > { %v405_v20 = vadd.f32 %v404_v15, %v401_v18  ;;  %p829_p4 = pneg %p828_p0 }
  0xa7   : > { %v407_v21 = vmul.f32 %v406_v19, %v405_v20  ;;  %p834_p7 = pnand %p832_p13, %p829_p4 }
  0xa9   : > { %v408_v22 = vsel %vm393_vm0, %v407_v21, 0.0 }
  0xaa   : > { %409 = vadd.xlane.f32.xlu0 %v408_v22 }
 0x137   : > { %v410_v23 = vpop.xlane.xlu0 %409 }
 0x138   : > { %v411_v24 = vrot.slane %v410_v23, 4 }
 0x13a   : > { %v412_v25 = vadd.f32 %v411_v24, %v410_v23 }
 0x13c   : > { %v413_v26 = vrot.slane %v412_v25, 2 }
 0x13e   : > { %v414_v27 = vadd.f32 %v413_v26, %v412_v25 }
 0x140   : > { %v415_v28 = vrot.slane %v414_v27, 1 }
 0x142   : > { %v416_v29 = vadd.f32 %v415_v28, %v414_v27 }
 0x144   : > { %615 = vpush %v416_v29 }
 0x175   : > { %s616_s19 = spop %615 }
 0x176   : > { %s419_s13 = scalar_select %p377_p11, 0.0, %s616_s19 }
 0x177   : > { %s1246_s19 = smov (!%p377_p11, %s616_s19), 0.0 }
 0x178   : > { %s420_s1 = sadd.f32 %s419_s13, %s418_s8 }
 0x179   : > { %s425_s21 = sadd.f32 %s606_s17, %s1246_s19 }
 0x17a   : > { %422 = sst [smem:[#allocation2]] %s420_s1  ;;  %s434_s26 = smul.f32 %s433_s15, %s420_s1 }
 0x17b   : > { %427 = sst [smem:[#allocation2 + $0x1]] %s425_s21  ;;  %s437_s18 = smul.f32 %s609_s12, %s425_s21 }
 0x17c   : > { %635 = sst [smem:[#allocation13]] (%p665_p9), %s434_s26  ;;  %s443_s9 = smul.f32 %s610_s14, %s434_s26 }
 0x17d   : > { %636 = sst [smem:[#allocation13 + $0x1]] (%p665_p9), %s437_s18  ;;  %s445_s7 = smul.f32 %s444_s29, %s437_s18 }
 0x17f   : > { %s446_s11 = sadd.f32 %s445_s7, %s443_s9 }
 0x181   : > { %637 = sst [smem:[#allocation13 + $0x2]] (%p665_p9), %s446_s11 }
 0x182   : > { %837 = shalt.err (!%p834_p7)
}
 0x183   : > { %s896_s14 = smov [#allocation13]  }
 0x184   : > { %639 = dma.smem_to_hbm (%p665_p9), %s896_s14, 16, %s1214_s6, [#allocation6]  }
 0x185   : > { %871 = dma.done.wait (%p665_p9), [#allocation6], 16  }
 0x186   : > { %873 = vsyncadd (%p665_p9), [#allocation6], 4294967280 }
 0x187   : > { %462 = sfence }
 0x188 PF: > { %p22_p3 = scmp.ge.s32.totalorder %s953_s25, 4   ;;  %s1239_s21 = smov %s880_s22 }
 0x189   : > { %s1240_s22 = smov %s884_s23  ;;  %s1241_s23 = smov %s963_s28 }
 0x18a   : > { %s1242_s24 = smov %s953_s25  ;;  %24 = sbr.rel (!%p22_p3) target bundleno = 11 (0xb), region = 133 }
 0x191   :  { %468 = vsyncpa [#allocation4], 1 }
 0x192   :  { %470 = vsyncpa [#allocation4 + $0x1], 1 }
 0x193   :  { %471 = vsyncpa [#allocation11], 1 }
 0x194   :  { %473 = vsyncpa [#allocation11 + $0x1], 1 }
 0x195   :  { %474 = vsyncpa [#allocation5], 1 }
 0x196   :  { %476 = vsyncpa [#allocation5 + $0x1], 1 }
 0x197   :  { %477 = vsyncpa [#allocation6], 1 }
 0x198   :  { %479 = vsyncpa [#allocation6 + $0x1], 1 }
 0x199   :  { %480 = vsyncpa [#allocation7], 1 }
 0x19a   :  { %482 = vsyncpa [#allocation7 + $0x1], 1 }

</bundles_post_ra>
